<compile_context>
chip_gen: v7x
topology: tpu7x:2x2x1
jax: 0.10.0
libtpu: 0.0.40
codegen_flags: <defaults>
</compile_context>

<pallas_src>
import jax
import jax.numpy as jnp
import numpy as np
from jax import lax
from jax.experimental import pallas as pl
from jax.experimental.pallas import tpu as pltpu


NBUF = 3  # gate-slab buffer depth: compute step t while steps t+1, t+2 are in flight


def _round_up(x: int, m: int) -> int:
    return ((x + m - 1) // m) * m


# --------------------------------------------------------------------------
# Kernel factory: one grid step == one batch block; the T recurrence is an
# in-kernel pl.loop with manual, 3-deep double-buffered DMA of the gate slab.
#   gates_hbm: (T*NB, BN, 4*Hp)  precomputed input-projection + bias, HBM (pl.ANY)
#   lens_ref : (BN, 1) int32     sequence lengths (padded rows = 0)
#   whh_ref  : (Hp, 4*Hp)        recurrent weights, per-gate lane-padded
#   wfc_ref  : (Hp, Ap)          lstm2action weights (padded)
#   bfc_ref  : (1, Ap)           lstm2action bias (padded)
#   out_ref  : (BN, Ap)          Q-values for this batch block
#   gbuf     : (NBUF, BN, 4*Hp)  streamed gate slabs (VMEM scratch)
#   sem      : DMA sems, one per buffer slot
#   h_sc/c_sc: (BN, Hp) f32      persistent recurrent state (VMEM scratch)
# --------------------------------------------------------------------------
def _make_kernel(T: int, NB: int, Hp: int, nbuf: int):

    def kernel(gates_hbm, lens_ref, whh_ref, wfc_ref, bfc_ref, out_ref,
               gbuf, sem, h_sc, c_sc):
        nb = pl.program_id(0)

        def fetch(t, slot):
            pltpu.make_async_copy(gates_hbm.at[t * NB + nb],
                                  gbuf.at[slot], sem.at[slot]).start()

        def wait(slot):
            pltpu.make_async_copy(gates_hbm.at[0],
                                  gbuf.at[slot], sem.at[slot]).wait()

        # Zero-init recurrent state (required for padded-lane correctness, see top).
        h_sc[...] = jnp.zeros_like(h_sc)
        c_sc[...] = jnp.zeros_like(c_sc)

        # Prime the DMA pipeline nbuf-1 steps deep (static prologue).
        for s in range(min(nbuf - 1, T)):
            fetch(s, s)

        @pl.loop(0, T)
        def _step(t):
            slot = t % nbuf

            # Issue the prefetch for step t+nbuf-1 first so its DMA overlaps the
            # wait + compute of step t (that buffer slot was freed at step t-1).
            @pl.when(t + (nbuf - 1) < T)
            def _prefetch():
                nxt = t + (nbuf - 1)
                fetch(nxt, nxt % nbuf)

            wait(slot)

            h = h_sc[...]
            c = c_sc[...]

            # Only the recurrent matmul sits on the serial chain; cast h to the
            # weight dtype so bf16 weights hit the bf16 MXU with f32 accumulation.
            gates = gbuf[slot].astype(jnp.float32) + jnp.dot(
                h.astype(whh_ref.dtype), whh_ref[...],
                preferred_element_type=jnp.float32)

            # Gate slices land on 128-lane tile boundaries (Hp multiple of 128).
            i_g = jax.nn.sigmoid(gates[:, 0 * Hp:1 * Hp])
            f_g = jax.nn.sigmoid(gates[:, 1 * Hp:2 * Hp])
            g_g = jnp.tanh(gates[:, 2 * Hp:3 * Hp])
            o_g = jax.nn.sigmoid(gates[:, 3 * Hp:4 * Hp])

            c_new = f_g * c + i_g * g_g
            h_new = o_g * jnp.tanh(c_new)

            # Freeze (h, c) once t >= len  ->  final h == state at step len-1,
            # matching PyTorch packed-sequence hn.
            valid = lens_ref[...] > t                    # (BN, 1) bool
            h_sc[...] = jnp.where(valid, h_new, h)
            c_sc[...] = jnp.where(valid, c_new, c)

        # Head: hn @ W_fc^T + b_fc, written once per batch block.
        hn = h_sc[...]
        out_ref[...] = (jnp.dot(hn.astype(wfc_ref.dtype), wfc_ref[...],
                                preferred_element_type=jnp.float32)
                        + bfc_ref[...])

    return kernel


# --------------------------------------------------------------------------
# Parameter init (deterministic, PyTorch-convention shapes)
# --------------------------------------------------------------------------
def init_params(key, vocab, emb_dim, img_repr, hidden, n_actions,
                padding_idx=0):
    ks = jax.random.split(key, 7)
    scale = 0.1
    D = img_repr + emb_dim
    embedding = scale * jax.random.normal(ks[0], (vocab, emb_dim), jnp.float32)
    embedding = embedding.at[padding_idx].set(0.0)       # padding_idx row = 0
    return {
        "embedding": embedding,
        "w_ih": scale * jax.random.normal(ks[1], (4 * hidden, D), jnp.float32),
        "w_hh": scale * jax.random.normal(ks[2], (4 * hidden, hidden), jnp.float32),
        "b_ih": scale * jax.random.normal(ks[3], (4 * hidden,), jnp.float32),
        "b_hh": scale * jax.random.normal(ks[4], (4 * hidden,), jnp.float32),
        "w_fc": scale * jax.random.normal(ks[5], (n_actions, hidden), jnp.float32),
        "b_fc": scale * jax.random.normal(ks[6], (n_actions,), jnp.float32),
    }


# --------------------------------------------------------------------------
# Wrapper: embedding lookup + hoisted input projection (one big XLA matmul,
# emitted time-major, off the serial chain) + padding + pallas_call.
# --------------------------------------------------------------------------
def action_decoder_forward(x1, x2, x2_lens, params, use_bf16_matmul=False):
    N, T = x2.shape
    assert T >= 1, "ActionDecoder requires at least one program token (T >= 1)"
    E = x1.shape[1]
    H = params["w_hh"].shape[1]
    A = params["w_fc"].shape[0]

    Np = _round_up(max(N, 8), 8)          # sublane-pad batch
    Hp = _round_up(H, 128)                # lane-pad each gate to a full tile
    Ap = _round_up(A, 128)                # lane-dense head output

    # Batch blocking: >= 2 blocks as soon as it pays (v7x 2-TC "parallel" split),
    # capped at 256 rows so the per-step working set stays VMEM/vreg friendly.
    if Np >= 512:
        BN = 256
    elif Np >= 16:
        BN = _round_up(Np // 2, 8)
    else:
        BN = Np
    Np = _round_up(Np, BN)
    NB = Np // BN

    # Split W_ih into image-repr columns (T-invariant) and embedding columns.
    w_ih = params["w_ih"]                                  # (4H, E+emb)
    w_ih_img_t = w_ih[:, :E].T                             # (E,   4H)
    w_ih_emb_t = w_ih[:, E:].T                             # (emb, 4H)
    bias = params["b_ih"] + params["b_hh"]                 # (4H,)

    # Hoisted input projection, produced directly TIME-MAJOR (no transpose copy).
    emb = jnp.take(params["embedding"], x2, axis=0).astype(jnp.float32)  # (N,T,emb)
    emb_proj = jnp.einsum("nte,eg->tng", emb, w_ih_emb_t)                # (T,N,4H)
    img_proj = x1.astype(jnp.float32) @ w_ih_img_t                       # (N,4H)
    gates_x = emb_proj + img_proj[None, :, :] + bias                     # (T,N,4H)

    # Pad per-gate to Hp lanes, batch to Np, then flatten (time, batch-block).
    gates_x = gates_x.reshape(T, N, 4, H)
    gates_x = jnp.pad(gates_x, ((0, 0), (0, Np - N), (0, 0), (0, Hp - H)))
    gates_x = gates_x.reshape(T, Np, 4 * Hp).reshape(T * NB, BN, 4 * Hp)

    # Recurrent / head weights, per-gate lane-padded and pre-transposed.
    w_hh_p = jnp.pad(params["w_hh"].T.reshape(H, 4, H),
                     ((0, Hp - H), (0, 0), (0, Hp - H))).reshape(Hp, 4 * Hp)
    w_fc_p = jnp.pad(params["w_fc"].T, ((0, Hp - H), (0, Ap - A)))       # (Hp,Ap)
    b_fc_p = jnp.pad(params["b_fc"], (0, Ap - A)).reshape(1, Ap)         # (1,Ap)

    if use_bf16_matmul:
        # bf16 MXU weights + bf16 streamed gates (halves the per-step DMA bytes).
        # Valid on v5e/v6e/v7x: all have bf16-native MXUs; h/c and accumulation
        # stay f32.  Result differs from the PyTorch f32 reference at ~1e-3.
        w_hh_p = w_hh_p.astype(jnp.bfloat16)
        w_fc_p = w_fc_p.astype(jnp.bfloat16)
        gates_x = gates_x.astype(jnp.bfloat16)

    lens2d = jnp.pad(x2_lens.astype(jnp.int32), (0, Np - N)).reshape(Np, 1)

    # Explicit scoped-VMEM budget: weights/bias/lens/out (x2 for pallas
    # double-buffering) + streamed gate buffers + f32 state, plus headroom.
    gate_bytes = gates_x.dtype.itemsize
    w_bytes = w_hh_p.dtype.itemsize
    vmem_needed = (
        2 * (Hp * 4 * Hp * w_bytes      # w_hh
             + Hp * Ap * w_bytes        # w_fc
             + Ap * 4                   # b_fc
             + BN * 4                   # lens block
             + BN * Ap * 4)             # out block
        + NBUF * BN * 4 * Hp * gate_bytes   # streamed gate slabs
        + 2 * BN * Hp * 4)                  # h, c state
    vmem_limit = int(min(max(vmem_needed * 1.5 + (2 << 20), 32 << 20), 128 << 20))

    kernel = _make_kernel(T=T, NB=NB, Hp=Hp, nbuf=NBUF)

    out_p = pl.pallas_call(
        kernel,
        out_shape=jax.ShapeDtypeStruct((Np, Ap), jnp.float32),
        grid=(NB,),
        in_specs=[
            pl.BlockSpec(memory_space=pl.ANY),                 # gates stay in HBM
            pl.BlockSpec((BN, 1), lambda nb: (nb, 0)),         # lens (per block)
            pl.BlockSpec((Hp, 4 * Hp), lambda nb: (0, 0)),     # w_hh (resident)
            pl.BlockSpec((Hp, Ap), lambda nb: (0, 0)),         # w_fc (resident)
            pl.BlockSpec((1, Ap), lambda nb: (0, 0)),          # b_fc
        ],
        out_specs=pl.BlockSpec((BN, Ap), lambda nb: (nb, 0)),
        scratch_shapes=[
            pltpu.VMEM((NBUF, BN, 4 * Hp), gates_x.dtype),     # gate stream buffers
            pltpu.SemaphoreType.DMA((NBUF,)),
            pltpu.VMEM((BN, Hp), jnp.float32),                 # h state
            pltpu.VMEM((BN, Hp), jnp.float32),                 # c state
        ],
        compiler_params=pltpu.CompilerParams(
            dimension_semantics=("parallel",),                 # v7x: 2-TC batch split
            vmem_limit_bytes=vmem_limit),
    )(gates_x, lens2d, w_hh_p, w_fc_p, b_fc_p)

    return out_p[:N, :A]


# --------------------------------------------------------------------------
# Pure-JAX reference (mirrors the PyTorch forward) for a correctness check
# --------------------------------------------------------------------------
def reference_forward(x1, x2, x2_lens, params):
    N, T = x2.shape
    H = params["w_hh"].shape[1]
    emb = jnp.take(params["embedding"], x2, axis=0)
    x = jnp.concatenate(
        [jnp.broadcast_to(x1[:, None, :], (N, T, x1.shape[1])), emb], axis=2)

    def step(carry, t):
        h, c = carry
        x_t = x[:, t, :]
        gates = (x_t @ params["w_ih"].T + params["b_ih"]
                 + h @ params["w_hh"].T + params["b_hh"])
        i = jax.nn.sigmoid(gates[:, :H])
        f = jax.nn.sigmoid(gates[:, H:2 * H])
        g = jnp.tanh(gates[:, 2 * H:3 * H])
        o = jax.nn.sigmoid(gates[:, 3 * H:])
        c_new = f * c + i * g
        h_new = o * jnp.tanh(c_new)
        valid = (x2_lens > t)[:, None]
        return (jnp.where(valid, h_new, h), jnp.where(valid, c_new, c)), None

    (hn, _), _ = lax.scan(step,
                          (jnp.zeros((N, H), jnp.float32),
                           jnp.zeros((N, H), jnp.float32)),
                          jnp.arange(T))
    return hn @ params["w_fc"].T + params["b_fc"]


if __name__ == "__main__":
    key = jax.random.PRNGKey(0)

    # --- test 1: tiny shapes, single batch block ---------------------------
    N, T = 2, 8
    VOCAB, EMB, IMG, HID, ACT = 12, 16, 16, 32, 6
    k_x1, k_x2, k_w, k_rest = jax.random.split(key, 4)
    x1 = jax.random.normal(k_x1, (N, IMG), jnp.float32)                 # encoder output
    x2 = jax.random.randint(k_x2, (N, T), 0, VOCAB).astype(jnp.int32)   # token ids
    x2_lens = jnp.array([8, 5], jnp.int32)                              # program lengths
    params = init_params(k_w, VOCAB, EMB, IMG, HID, ACT)

    out = action_decoder_forward(x1, x2, x2_lens, params)
    jax.block_until_ready(out)
    ref = reference_forward(x1, x2, x2_lens, params)
    np.testing.assert_allclose(np.asarray(out), np.asarray(ref),
                               rtol=1e-4, atol=1e-4)

    # bf16-weight / bf16-gate MXU path: looser tolerance vs the f32 reference.
    out_bf16 = action_decoder_forward(x1, x2, x2_lens, params,
                                      use_bf16_matmul=True)
    jax.block_until_ready(out_bf16)
    np.testing.assert_allclose(np.asarray(out_bf16), np.asarray(ref),
                               rtol=5e-2, atol=3e-2)

    # --- test 2: multi-block batch (exercises the "parallel" grid axis) ----
    N2, T2 = 20, 6
    VOCAB2, EMB2, IMG2, HID2, ACT2 = 12, 16, 16, 48, 10
    ka, kb, kc, kd = jax.random.split(k_rest, 4)
    x1b = jax.random.normal(ka, (N2, IMG2), jnp.float32)
    x2b = jax.random.randint(kb, (N2, T2), 0, VOCAB2).astype(jnp.int32)
    lens_b = jax.random.randint(kc, (N2,), 1, T2 + 1).astype(jnp.int32)
    params2 = init_params(kd, VOCAB2, EMB2, IMG2, HID2, ACT2)

    out2 = action_decoder_forward(x1b, x2b, lens_b, params2)
    jax.block_until_ready(out2)
    ref2 = reference_forward(x1b, x2b, lens_b, params2)
    np.testing.assert_allclose(np.asarray(out2), np.asarray(ref2),
                               rtol=1e-4, atol=1e-4)

    print("KERNEL_OK")
</pallas_src>

<mosaic_0001>
module attributes {stable_mosaic.version = 11 : i64} {
  func.func @kernel(%arg0: i32, %arg1: memref<8x8x512xf32, #tpu.memory_space<any>>, %arg2: memref<8x1xi32, #tpu.memory_space<vmem>>, %arg3: memref<128x512xf32, #tpu.memory_space<vmem>>, %arg4: memref<128x128xf32, #tpu.memory_space<vmem>>, %arg5: memref<1x128xf32, #tpu.memory_space<vmem>>, %arg6: memref<8x128xf32, #tpu.memory_space<vmem>>, %arg7: memref<3x8x512xf32, #tpu.memory_space<vmem>>, %arg8: memref<3x!tpu.dma_semaphore, #tpu.memory_space<semaphore_mem>>, %arg9: memref<8x128xf32, #tpu.memory_space<vmem>>, %arg10: memref<8x128xf32, #tpu.memory_space<vmem>>) attributes {dimension_semantics = [#tpu.dimension_semantics<parallel>], iteration_bounds = array<i64: 1>, scalar_prefetch = 0 : i64, scratch_operands = 4 : i64, tpu.core_type = #tpu.core_type<tc>, window_params = [{}, {transform_indices = @transform_1, window_bounds = array<i64: 8, 1>}, {pipeline_mode = #tpu.pipeline_mode<synchronous>, transform_indices = @transform_2, window_bounds = array<i64: 128, 512>}, {pipeline_mode = #tpu.pipeline_mode<synchronous>, transform_indices = @transform_3, window_bounds = array<i64: 128, 128>}, {pipeline_mode = #tpu.pipeline_mode<synchronous>, transform_indices = @transform_4, window_bounds = array<i64: 1, 128>}, {transform_indices = @transform_5, window_bounds = array<i64: 8, 128>}]} {
    %cst = arith.constant 0.000000e+00 : f32
    %0 = vector.broadcast %cst : f32 to vector<8x128xf32>
    %c0 = arith.constant 0 : index
    %c0_0 = arith.constant 0 : index
    %1 = vector.load %arg9[%c0, %c0_0] : memref<8x128xf32, #tpu.memory_space<vmem>>, vector<8x128xf32>
    tpu.vector_store %arg9[%c0, %c0_0], %0 {strides = array<i32>} : memref<8x128xf32, #tpu.memory_space<vmem>>, vector<8x128xf32>,
    %cst_1 = arith.constant 0.000000e+00 : f32
    %2 = vector.broadcast %cst_1 : f32 to vector<8x128xf32>
    %c0_2 = arith.constant 0 : index
    %c0_3 = arith.constant 0 : index
    %3 = vector.load %arg10[%c0_2, %c0_3] : memref<8x128xf32, #tpu.memory_space<vmem>>, vector<8x128xf32>
    tpu.vector_store %arg10[%c0_2, %c0_3], %2 {strides = array<i32>} : memref<8x128xf32, #tpu.memory_space<vmem>>, vector<8x128xf32>,
    %c0_i32 = arith.constant 0 : i32
    %4 = arith.addi %c0_i32, %arg0 : i32
    %c0_i32_4 = arith.constant 0 : i32
    %c0_i32_5 = arith.constant 0 : i32
    %c0_i32_6 = arith.constant 0 : i32
    %c0_i32_7 = arith.constant 0 : i32
    %5 = tpu.memref_slice %arg1[%4, %c0_i32_6, %c0_i32_7] : memref<8x8x512xf32, #tpu.memory_space<any>> -> memref<1x8x512xf32, #tpu.memory_space<any>>
    %6 = tpu.memref_squeeze %5 : memref<1x8x512xf32, #tpu.memory_space<any>> -> memref<8x512xf32, #tpu.memory_space<any>>
    %c0_i32_8 = arith.constant 0 : i32
    %c0_i32_9 = arith.constant 0 : i32
    %7 = tpu.memref_slice %arg7[%c0_i32_4, %c0_i32_8, %c0_i32_9] : memref<3x8x512xf32, #tpu.memory_space<vmem>> -> memref<1x8x512xf32, #tpu.memory_space<vmem>>
    %8 = tpu.memref_squeeze %7 : memref<1x8x512xf32, #tpu.memory_space<vmem>> -> memref<8x512xf32, #tpu.memory_space<vmem>>
    %9 = tpu.memref_slice %arg8[%c0_i32_5] : memref<3x!tpu.dma_semaphore, #tpu.memory_space<semaphore_mem>> -> memref<1x!tpu.dma_semaphore, #tpu.memory_space<semaphore_mem>>
    %10 = tpu.memref_squeeze %9 : memref<1x!tpu.dma_semaphore, #tpu.memory_space<semaphore_mem>> -> memref<!tpu.dma_semaphore, #tpu.memory_space<semaphore_mem>>
    tpu.enqueue_dma source(%6 : memref<8x512xf32, #tpu.memory_space<any>>) target(%8 : memref<8x512xf32, #tpu.memory_space<vmem>>) target_semaphore(%10 : memref<!tpu.dma_semaphore, #tpu.memory_space<semaphore_mem>>)
    %c1_i32 = arith.constant 1 : i32
    %11 = arith.addi %c1_i32, %arg0 : i32
    %c1_i32_10 = arith.constant 1 : i32
    %c1_i32_11 = arith.constant 1 : i32
    %c0_i32_12 = arith.constant 0 : i32
    %c0_i32_13 = arith.constant 0 : i32
    %12 = tpu.memref_slice %arg1[%11, %c0_i32_12, %c0_i32_13] : memref<8x8x512xf32, #tpu.memory_space<any>> -> memref<1x8x512xf32, #tpu.memory_space<any>>
    %13 = tpu.memref_squeeze %12 : memref<1x8x512xf32, #tpu.memory_space<any>> -> memref<8x512xf32, #tpu.memory_space<any>>
    %c0_i32_14 = arith.constant 0 : i32
    %c0_i32_15 = arith.constant 0 : i32
    %14 = tpu.memref_slice %arg7[%c1_i32_10, %c0_i32_14, %c0_i32_15] : memref<3x8x512xf32, #tpu.memory_space<vmem>> -> memref<1x8x512xf32, #tpu.memory_space<vmem>>
    %15 = tpu.memref_squeeze %14 : memref<1x8x512xf32, #tpu.memory_space<vmem>> -> memref<8x512xf32, #tpu.memory_space<vmem>>
    %16 = tpu.memref_slice %arg8[%c1_i32_11] : memref<3x!tpu.dma_semaphore, #tpu.memory_space<semaphore_mem>> -> memref<1x!tpu.dma_semaphore, #tpu.memory_space<semaphore_mem>>
    %17 = tpu.memref_squeeze %16 : memref<1x!tpu.dma_semaphore, #tpu.memory_space<semaphore_mem>> -> memref<!tpu.dma_semaphore, #tpu.memory_space<semaphore_mem>>
    tpu.enqueue_dma source(%13 : memref<8x512xf32, #tpu.memory_space<any>>) target(%15 : memref<8x512xf32, #tpu.memory_space<vmem>>) target_semaphore(%17 : memref<!tpu.dma_semaphore, #tpu.memory_space<semaphore_mem>>)
    %c0_i32_16 = arith.constant 0 : i32
    %c8_i32 = arith.constant 8 : i32
    %18 = arith.addi %c0_i32_16, %c8_i32 : i32
    %c1_i32_17 = arith.constant 1 : i32
    scf.for %arg11 = %c0_i32_16 to %18 step %c1_i32_17  : i32 {
      %c1_i32_28 = arith.constant 1 : i32
      %26 = arith.muli %arg11, %c1_i32_28 : i32
      %c0_i32_29 = arith.constant 0 : i32
      %27 = arith.addi %c0_i32_29, %26 : i32
      %c3_i32 = arith.constant 3 : i32
      %c0_i32_30 = arith.constant 0 : i32
      %28 = arith.cmpi eq, %c3_i32, %c0_i32_30 : i32
      %c1_i32_31 = arith.constant 1 : i32
      %29 = arith.select %28, %c1_i32_31, %c3_i32 : i32
      %30 = arith.remsi %27, %29 : i32
      %c0_i32_32 = arith.constant 0 : i32
      %31 = arith.cmpi ne, %30, %c0_i32_32 : i32
      %c0_i32_33 = arith.constant 0 : i32
      %32 = arith.cmpi slt, %30, %c0_i32_33 : i32
      %c0_i32_34 = arith.constant 0 : i32
      %33 = arith.cmpi slt, %29, %c0_i32_34 : i32
      %34 = arith.xori %32, %33 : i1
      %35 = arith.andi %34, %31 : i1
      %36 = arith.addi %30, %29 : i32
      %37 = arith.select %35, %36, %30 : i32
      %c2_i32 = arith.constant 2 : i32
      %38 = arith.addi %27, %c2_i32 : i32
      %c8_i32_35 = arith.constant 8 : i32
      %39 = arith.cmpi slt, %38, %c8_i32_35 : i32
      %40 = arith.extui %39 : i1 to i32
      %c0_i32_36 = arith.constant 0 : i32
      %41 = arith.cmpi ne, %40, %c0_i32_36 : i32
      scf.if %41 {
        %c2_i32_60 = arith.constant 2 : i32
        %92 = arith.addi %27, %c2_i32_60 : i32
        %c3_i32_61 = arith.constant 3 : i32
        %c0_i32_62 = arith.constant 0 : i32
        %93 = arith.cmpi eq, %c3_i32_61, %c0_i32_62 : i32
        %c1_i32_63 = arith.constant 1 : i32
        %94 = arith.select %93, %c1_i32_63, %c3_i32_61 : i32
        %95 = arith.remsi %92, %94 : i32
        %c0_i32_64 = arith.constant 0 : i32
        %96 = arith.cmpi ne, %95, %c0_i32_64 : i32
        %c0_i32_65 = arith.constant 0 : i32
        %97 = arith.cmpi slt, %95, %c0_i32_65 : i32
        %c0_i32_66 = arith.constant 0 : i32
        %98 = arith.cmpi slt, %94, %c0_i32_66 : i32
        %99 = arith.xori %97, %98 : i1
        %100 = arith.andi %99, %96 : i1
        %101 = arith.addi %95, %94 : i32
        %102 = arith.select %100, %101, %95 : i32
        %c1_i32_67 = arith.constant 1 : i32
        %103 = arith.muli %92, %c1_i32_67 : i32
        %104 = arith.addi %103, %arg0 : i32
        %c0_i32_68 = arith.constant 0 : i32
        %c0_i32_69 = arith.constant 0 : i32
        %105 = tpu.memref_slice %arg1[%104, %c0_i32_68, %c0_i32_69] : memref<8x8x512xf32, #tpu.memory_space<any>> -> memref<1x8x512xf32, #tpu.memory_space<any>>
        %106 = tpu.memref_squeeze %105 : memref<1x8x512xf32, #tpu.memory_space<any>> -> memref<8x512xf32, #tpu.memory_space<any>>
        %c0_i32_70 = arith.constant 0 : i32
        %c0_i32_71 = arith.constant 0 : i32
        %107 = tpu.memref_slice %arg7[%102, %c0_i32_70, %c0_i32_71] : memref<3x8x512xf32, #tpu.memory_space<vmem>> -> memref<1x8x512xf32, #tpu.memory_space<vmem>>
        %108 = tpu.memref_squeeze %107 : memref<1x8x512xf32, #tpu.memory_space<vmem>> -> memref<8x512xf32, #tpu.memory_space<vmem>>
        %109 = tpu.memref_slice %arg8[%102] : memref<3x!tpu.dma_semaphore, #tpu.memory_space<semaphore_mem>> -> memref<1x!tpu.dma_semaphore, #tpu.memory_space<semaphore_mem>>
        %110 = tpu.memref_squeeze %109 : memref<1x!tpu.dma_semaphore, #tpu.memory_space<semaphore_mem>> -> memref<!tpu.dma_semaphore, #tpu.memory_space<semaphore_mem>>
        tpu.enqueue_dma source(%106 : memref<8x512xf32, #tpu.memory_space<any>>) target(%108 : memref<8x512xf32, #tpu.memory_space<vmem>>) target_semaphore(%110 : memref<!tpu.dma_semaphore, #tpu.memory_space<semaphore_mem>>)
      } else {
      }
      %c0_i32_37 = arith.constant 0 : i32
      %c0_i32_38 = arith.constant 0 : i32
      %c0_i32_39 = arith.constant 0 : i32
      %42 = tpu.memref_slice %arg1[%c0_i32_37, %c0_i32_38, %c0_i32_39] : memref<8x8x512xf32, #tpu.memory_space<any>> -> memref<1x8x512xf32, #tpu.memory_space<any>>
      %43 = tpu.memref_squeeze %42 : memref<1x8x512xf32, #tpu.memory_space<any>> -> memref<8x512xf32, #tpu.memory_space<any>>
      %c0_i32_40 = arith.constant 0 : i32
      %c0_i32_41 = arith.constant 0 : i32
      %44 = tpu.memref_slice %arg7[%37, %c0_i32_40, %c0_i32_41] : memref<3x8x512xf32, #tpu.memory_space<vmem>> -> memref<1x8x512xf32, #tpu.memory_space<vmem>>
      %45 = tpu.memref_squeeze %44 : memref<1x8x512xf32, #tpu.memory_space<vmem>> -> memref<8x512xf32, #tpu.memory_space<vmem>>
      %46 = tpu.memref_slice %arg8[%37] : memref<3x!tpu.dma_semaphore, #tpu.memory_space<semaphore_mem>> -> memref<1x!tpu.dma_semaphore, #tpu.memory_space<semaphore_mem>>
      %47 = tpu.memref_squeeze %46 : memref<1x!tpu.dma_semaphore, #tpu.memory_space<semaphore_mem>> -> memref<!tpu.dma_semaphore, #tpu.memory_space<semaphore_mem>>
      tpu.wait_dma2 semaphore(%47 : memref<!tpu.dma_semaphore, #tpu.memory_space<semaphore_mem>>) src(%43 : memref<8x512xf32, #tpu.memory_space<any>>) dst(%45 : memref<8x512xf32, #tpu.memory_space<vmem>>)
      %c0_42 = arith.constant 0 : index
      %c0_43 = arith.constant 0 : index
      %48 = vector.load %arg9[%c0_42, %c0_43] : memref<8x128xf32, #tpu.memory_space<vmem>>, vector<8x128xf32>
      %c0_44 = arith.constant 0 : index
      %c0_45 = arith.constant 0 : index
      %49 = vector.load %arg10[%c0_44, %c0_45] : memref<8x128xf32, #tpu.memory_space<vmem>>, vector<8x128xf32>
      %50 = arith.index_cast %37 : i32 to index
      %c0_46 = arith.constant 0 : index
      %c0_47 = arith.constant 0 : index
      %51 = vector.load %arg7[%50, %c0_46, %c0_47] : memref<3x8x512xf32, #tpu.memory_space<vmem>>, vector<1x8x512xf32>
      %52 = vector.shape_cast %51 : vector<1x8x512xf32> to vector<8x512xf32>
      %c0_48 = arith.constant 0 : index
      %c0_49 = arith.constant 0 : index
      %53 = vector.load %arg3[%c0_48, %c0_49] : memref<128x512xf32, #tpu.memory_space<vmem>>, vector<128x512xf32>
      %cst_50 = arith.constant dense<0.000000e+00> : vector<8x512xf32>
      %54 = tpu.matmul %48, %53, %cst_50 {dimension_numbers = #tpu.dot_dimension_numbers<[1], [0], [0], [1], [0, 0, 1, 1], [], []>} : vector<8x128xf32>, vector<128x512xf32>, vector<8x512xf32> -> vector<8x512xf32>
      %55 = arith.addf %52, %54 : vector<8x512xf32>
      %56 = vector.extract_strided_slice %55 {offsets = [0, 0], sizes = [8, 128], strides = [1, 1]} : vector<8x512xf32> to vector<8x128xf32>
      %57 = arith.negf %56 : vector<8x128xf32>
      %58 = math.exp %57 : vector<8x128xf32>
      %cst_51 = arith.constant 1.000000e+00 : f32
      %59 = vector.broadcast %cst_51 : f32 to vector<8x128xf32>
      %60 = arith.addf %59, %58 : vector<8x128xf32>
      %61 = arith.divf %59, %60 : vector<8x128xf32>
      %62 = vector.extract_strided_slice %55 {offsets = [0, 128], sizes = [8, 128], strides = [1, 1]} : vector<8x512xf32> to vector<8x128xf32>
      %63 = arith.negf %62 : vector<8x128xf32>
      %64 = math.exp %63 : vector<8x128xf32>
      %cst_52 = arith.constant 1.000000e+00 : f32
      %65 = vector.broadcast %cst_52 : f32 to vector<8x128xf32>
      %66 = arith.addf %65, %64 : vector<8x128xf32>
      %67 = arith.divf %65, %66 : vector<8x128xf32>
      %68 = vector.extract_strided_slice %55 {offsets = [0, 256], sizes = [8, 128], strides = [1, 1]} : vector<8x512xf32> to vector<8x128xf32>
      %69 = math.tanh %68 : vector<8x128xf32>
      %70 = vector.extract_strided_slice %55 {offsets = [0, 384], sizes = [8, 128], strides = [1, 1]} : vector<8x512xf32> to vector<8x128xf32>
      %71 = arith.negf %70 : vector<8x128xf32>
      %72 = math.exp %71 : vector<8x128xf32>
      %cst_53 = arith.constant 1.000000e+00 : f32
      %73 = vector.broadcast %cst_53 : f32 to vector<8x128xf32>
      %74 = arith.addf %73, %72 : vector<8x128xf32>
      %75 = arith.divf %73, %74 : vector<8x128xf32>
      %76 = arith.mulf %67, %49 : vector<8x128xf32>
      %77 = arith.mulf %61, %69 : vector<8x128xf32>
      %78 = arith.addf %76, %77 : vector<8x128xf32>
      %79 = math.tanh %78 : vector<8x128xf32>
      %80 = arith.mulf %75, %79 : vector<8x128xf32>
      %c0_54 = arith.constant 0 : index
      %c0_55 = arith.constant 0 : index
      %81 = vector.load %arg2[%c0_54, %c0_55] : memref<8x1xi32, #tpu.memory_space<vmem>>, vector<8x1xi32>
      %82 = vector.broadcast %27 : i32 to vector<8x1xi32>
      %83 = arith.cmpi sgt, %81, %82 : vector<8x1xi32>
      %84 = vector.shape_cast %83 : vector<8x1xi1> to vector<8x1xi1>
      %85 = vector.broadcast %84 : vector<8x1xi1> to vector<8x128xi1>
      %86 = arith.select %85, %80, %48 : vector<8x128xi1>, vector<8x128xf32>
      %c0_56 = arith.constant 0 : index
      %c0_57 = arith.constant 0 : index
      %87 = vector.load %arg9[%c0_56, %c0_57] : memref<8x128xf32, #tpu.memory_space<vmem>>, vector<8x128xf32>
      tpu.vector_store %arg9[%c0_56, %c0_57], %86 {strides = array<i32>} : memref<8x128xf32, #tpu.memory_space<vmem>>, vector<8x128xf32>,
      %88 = vector.shape_cast %83 : vector<8x1xi1> to vector<8x1xi1>
      %89 = vector.broadcast %88 : vector<8x1xi1> to vector<8x128xi1>
      %90 = arith.select %89, %78, %49 : vector<8x128xi1>, vector<8x128xf32>
      %c0_58 = arith.constant 0 : index
      %c0_59 = arith.constant 0 : index
      %91 = vector.load %arg10[%c0_58, %c0_59] : memref<8x128xf32, #tpu.memory_space<vmem>>, vector<8x128xf32>
      tpu.vector_store %arg10[%c0_58, %c0_59], %90 {strides = array<i32>} : memref<8x128xf32, #tpu.memory_space<vmem>>, vector<8x128xf32>,
    }
    %c8_i32_18 = arith.constant 8 : i32
    %c0_19 = arith.constant 0 : index
    %c0_20 = arith.constant 0 : index
    %19 = vector.load %arg9[%c0_19, %c0_20] : memref<8x128xf32, #tpu.memory_space<vmem>>, vector<8x128xf32>
    %c0_21 = arith.constant 0 : index
    %c0_22 = arith.constant 0 : index
    %20 = vector.load %arg4[%c0_21, %c0_22] : memref<128x128xf32, #tpu.memory_space<vmem>>, vector<128x128xf32>
    %cst_23 = arith.constant dense<0.000000e+00> : vector<8x128xf32>
    %21 = tpu.matmul %19, %20, %cst_23 {dimension_numbers = #tpu.dot_dimension_numbers<[1], [0], [0], [1], [0, 0, 1, 1], [], []>} : vector<8x128xf32>, vector<128x128xf32>, vector<8x128xf32> -> vector<8x128xf32>
    %c0_24 = arith.constant 0 : index
    %c0_25 = arith.constant 0 : index
    %22 = vector.load %arg5[%c0_24, %c0_25] : memref<1x128xf32, #tpu.memory_space<vmem>>, vector<1x128xf32>
    %23 = vector.broadcast %22 : vector<1x128xf32> to vector<8x128xf32>
    %24 = arith.addf %21, %23 : vector<8x128xf32>
    %c0_26 = arith.constant 0 : index
    %c0_27 = arith.constant 0 : index
    %25 = vector.load %arg6[%c0_26, %c0_27] : memref<8x128xf32, #tpu.memory_space<vmem>>, vector<8x128xf32>
    tpu.vector_store %arg6[%c0_26, %c0_27], %24 {strides = array<i32>} : memref<8x128xf32, #tpu.memory_space<vmem>>, vector<8x128xf32>,
    return
  }
  func.func @transform_1(%arg0: i32) -> (i32, i32) {
    %c0_i32 = arith.constant 0 : i32
    %c0_i32_0 = arith.constant 0 : i32
    return %arg0, %c0_i32 : i32, i32
  }
  func.func @transform_2(%arg0: i32) -> (i32, i32) {
    %c0_i32 = arith.constant 0 : i32
    %c0_i32_0 = arith.constant 0 : i32
    %c0_i32_1 = arith.constant 0 : i32
    return %c0_i32, %c0_i32_0 : i32, i32
  }
  func.func @transform_3(%arg0: i32) -> (i32, i32) {
    %c0_i32 = arith.constant 0 : i32
    %c0_i32_0 = arith.constant 0 : i32
    %c0_i32_1 = arith.constant 0 : i32
    return %c0_i32, %c0_i32_0 : i32, i32
  }
  func.func @transform_4(%arg0: i32) -> (i32, i32) {
    %c0_i32 = arith.constant 0 : i32
    %c0_i32_0 = arith.constant 0 : i32
    %c0_i32_1 = arith.constant 0 : i32
    return %c0_i32, %c0_i32_0 : i32, i32
  }
  func.func @transform_5(%arg0: i32) -> (i32, i32) {
    %c0_i32 = arith.constant 0 : i32
    %c0_i32_0 = arith.constant 0 : i32
    return %arg0, %c0_i32 : i32, i32
  }
}

</mosaic_0001>

<bundles_post_ra>
// kernel: tpu_custom_call.1
= control target key start
LH: loop header
LB: loop body
LE: loop exit
PB: predicated region body
PF: predicated region fallthrough
CT: control target
= control target key end

     0   :  { %10 = vsyncpa [#allocation7], 0  ;;  %s1103_s0 = inlined_call_operand.hbm [shape: f32[8,8,512], index: 0, kind: input, shape index: {}]   ;;  %s1104_s1 = inlined_call_operand.vmem [shape: s32[8,1], index: 1, kind: input, shape index: {}]   ;;  %s1105_s2 = inlined_call_operand.hbm [shape: f32[128,512], index: 2, kind: input, shape index: {}]   ;;  %s1106_s3 = inlined_call_operand.hbm [shape: f32[128,128], index: 3, kind: input, shape index: {}]   ;;  %s1107_s4 = inlined_call_operand.vmem [shape: f32[1,128], index: 4, kind: input, shape index: {}]   ;;  %s1108_s5 = inlined_call_operand.hbm [shape: f32[8,128], index: 5, kind: output, shape index: {}]  }
   0x1   :  { %11 = vsyncpa [#allocation10], 0 }
   0x2   :  { %12 = vsyncpa [#allocation8], 0  ;;  %s908_s18 = smov [#allocation6]   ;;  %s750_s22 = scalar_lea.hbm %s1105_s2, 8192 }
   0x3   :  { %s20_s19 = sshll.u32 %s908_s18, 4  ;;  %p751_p0 = scmp.ne.s32.totalorder %s1105_s2, %s750_s22  ;;  %s21_s19 = int_to_ptr.vmem [resolvable:$true] %s20_s19 }
   0x4   :  { %p754_p1 = scmp.lt.u32.totalorder %s750_s22, %s1105_s2 }
   0x6   :  { %p756_p2 = pnand %p754_p1, %p751_p0 }
   0x8   :  { %759 = shalt.err (!%p756_p2)
}
   0x9   :  { %s760_s27 = scalar_lea.vmem %s21_s19, 8192  ;;  %p765_p4 = scmp.lt.s32.totalorder %s21_s19, %s21_s19 }
   0xa   :  { %p761_p3 = scmp.ne.s32.totalorder %s21_s19, %s760_s27  ;;  %p766_p5 = scmp.lt.s32.totalorder %s760_s27, %s760_s27 }
   0xc   :  { %p767_p6 = por %p766_p5, %p765_p4 }
   0xe   :  { %p768_p7 = pnand %p767_p6, %p761_p3 }
  0x10   :  { %771 = shalt.err (!%p768_p7)
}
  0x11   :  { %s909_s28 = smov 512   ;;  %s910_s29 = smov 32  }
  0x12   :  { %26 = dma.hbm_to_vmem [thread:$0]  %s1105_s2, 8192, %s21_s19, [#allocation7], %s909_s28, %s909_s28, %s910_s29  }
  0x13   :  { %s911_s7 = smov [#allocation9]   ;;  %s772_s11 = scalar_lea.hbm %s1106_s3, 2048 }
  0x14   :  { %s32_s8 = sshll.u32 %s911_s7, 4  ;;  %p773_p8 = scmp.ne.s32.totalorder %s1106_s3, %s772_s11  ;;  %s33_s8 = int_to_ptr.vmem [resolvable:$true] %s32_s8 }
  0x15   :  { %p776_p9 = scmp.lt.u32.totalorder %s772_s11, %s1106_s3 }
  0x17   :  { %p778_p10 = pnand %p776_p9, %p773_p8 }
  0x19   :  { %781 = shalt.err (!%p778_p10)
}
  0x1a   :  { %s782_s16 = scalar_lea.vmem %s33_s8, 2048  ;;  %p787_p12 = scmp.lt.s32.totalorder %s33_s8, %s33_s8 }
  0x1b   :  { %p783_p11 = scmp.ne.s32.totalorder %s33_s8, %s782_s16  ;;  %p788_p13 = scmp.lt.s32.totalorder %s782_s16, %s782_s16 }
  0x1d   :  { %p789_p0 = por %p788_p13, %p787_p12 }
  0x1f   :  { %p790_p1 = pnand %p789_p0, %p783_p11 }
  0x21   :  { %793 = shalt.err (!%p790_p1)
}
  0x22   :  { %s912_s2 = smov 128   ;;  %s913_s17 = smov 8  }
  0x23   :  { %38 = dma.hbm_to_vmem [thread:$0]  %s1106_s3, 2048, %s33_s8, [#allocation10], %s912_s2, %s912_s2, %s913_s17  }
  0x24   :  { %896 = dma.done.wait [#allocation7], 8192  }
  0x25   :  { %897 = vsyncadd [#allocation7], 4294959104 }
  0x26   :  { %898 = dma.done.wait [#allocation10], 2048  }
  0x27   :  { %899 = vsyncadd [#allocation10], 4294965248  ;;  %s979_s22 = scalar_lea.hbm %s1103_s0, 512  ;;  %s914_s23 = smov [#allocation2]   ;;  %v915_v0 = vmov 0.0  }
  0x28   :  { %s59_s24 = sshll.u32 %s914_s23, 4  ;;  %47 = vst [vmem:[#allocation4] sm:$0xff] %v915_v0  ;;  %48 = vst [vmem:[#allocation5] sm:$0xff] %v915_v0  ;;  %s916_s3 = smov [#allocation2 + $0x20]   ;;  %s983_s24 = int_to_ptr.vmem [resolvable:$true] %s59_s24 }
  0x29   :  { %s76_s25 = sshll.u32 %s916_s3, 4  ;;  %p795_p2 = scmp.ne.s32.totalorder %s1103_s0, %s979_s22  ;;  %s77_s25 = int_to_ptr.vmem [resolvable:$true] %s76_s25 }
  0x2a   :  { %s992_s30 = scalar_lea.hbm %s1103_s0, 4096  ;;  %p798_p4 = scmp.lt.u32.totalorder %s979_s22, %s1103_s0 }
  0x2b   :  { %p797_p3 = scmp.lt.u32.totalorder %s992_s30, %s979_s22 }
  0x2d   :  { %p799_p5 = por %p798_p4, %p797_p3 }
  0x2f   :  { %p800_p6 = pnand %p799_p5, %p795_p2 }
  0x31   :  { %803 = shalt.err (!%p800_p6)  }
  0x32   :  { %s804_s10 = scalar_lea.vmem %s983_s24, 512  ;;  %s1008_s11 = scalar_lea.vmem %s983_s24, 1536 }
  0x33   :  { %p805_p7 = scmp.ne.s32.totalorder %s983_s24, %s804_s10  ;;  %p809_p8 = scmp.lt.s32.totalorder %s983_s24, %s983_s24 }
  0x34   :  { %p810_p9 = scmp.lt.s32.totalorder %s1008_s11, %s804_s10 }
  0x36   :  { %p811_p10 = por %p810_p9, %p809_p8 }
  0x38   :  { %p812_p11 = pnand %p811_p10, %p805_p7 }
  0x3a   :  { %815 = shalt.err (!%p812_p11)  }
  0x3b   :  { %62 = dma.hbm_to_vmem [thread:$0]  %s1103_s0, 512, %s983_s24, [#allocation3] }
  0x3c   :  { %s840_s16 = scalar_lea.hbm %s1103_s0, 1024 }
  0x3d   :  { %p817_p12 = scmp.ne.s32.totalorder %s979_s22, %s840_s16  ;;  %p820_p13 = scmp.lt.u32.totalorder %s992_s30, %s840_s16 }
  0x3e   :  { %p822_p1 = scmp.lt.u32.totalorder %s840_s16, %s979_s22 }
  0x3f   :  { %p821_p0 = por %p820_p13, %p798_p4 }
  0x41   :  { %p823_p2 = por %p822_p1, %p821_p0 }
  0x43   :  { %p824_p3 = pnand %p823_p2, %p817_p12 }
  0x45   :  { %827 = shalt.err (!%p824_p3)  }
  0x46   :  { %s828_s18 = scalar_lea.vmem %s77_s25, 512  ;;  %p833_p6 = scmp.lt.s32.totalorder %s77_s25, %s983_s24 }
  0x47   :  { %p829_p5 = scmp.ne.s32.totalorder %s77_s25, %s828_s18  ;;  %p834_p7 = scmp.lt.s32.totalorder %s1008_s11, %s828_s18 }
  0x49   :  { %p835_p8 = por %p834_p7, %p833_p6 }
  0x4b   :  { %p836_p9 = pnand %p835_p8, %p829_p5 }
  0x4d   :  { %839 = shalt.err (!%p836_p9)  }
  0x4e   :  { %79 = dma.hbm_to_vmem [thread:$0]  %s979_s22, 512, %s77_s25, [#allocation3 + $0x1] }
  0x4f   :  { %s1031_s19 = smov 0  }
  0x50 LB: > { %s87_s20 = ssub.s32 0, %s906_s19  ;;  %s1039_s23 = sadd.s32 2, %s906_s19  ;;  %s906_s19 = sphi %s1031_s19, %s85_s19  }
  0x51   : > { %s542_s21 = smin.u32 %s906_s19, %s87_s20  ;;  %s105_s22 = ssub.s32 0, %s1039_s23 }
  0x52   : > { %729 = sdivrem.u32 %s542_s21, 3  ;;  %s546_s3 = smin.u32 %s105_s22, %s1039_s23 }
  0x53   : > { %731 = sdivrem.u32 %s546_s3, 3  ;;  %p86_p4 = scmp.lt.s32.totalorder %s906_s19, 0 }
  0x54   : > { %p104_p10 = scmp.lt.s32.totalorder %s1039_s23, 0  ;;  %s549_s6 = sshll.u32 %s906_s19, 9 }
  0x55   : > { %s529_s12 = scalar_lea.hbm %s1103_s0, %s549_s6  ;;  %p705_p13 = scmp.lt.s32.totalorder %s1039_s23, 8 }
  0x56   : > { %s530_s14 = scalar_lea.hbm %s529_s12, 1024  ;;  %s869_s17 = scalar_lea.hbm %s529_s12, 1536 }
  0x57   : > { %p842_p0 = scmp.ne.s32.totalorder %s530_s14, %s869_s17  ;;  %p846_p3 = scmp.lt.u32.totalorder %s530_s14, %s1103_s0 }
  0x58   : > { %p847_p5 = scmp.lt.u32.totalorder %s992_s30, %s869_s17  ;;  %p849_p7 = scmp.lt.u32.totalorder %s869_s17, %s530_s14 }
  0x59   : > { %p843_p1 = pnand %p842_p0, %p705_p13 }
  0x5a   : > { %p848_p6 = por %p847_p5, %p846_p3 }
  0x5b   : > { %s730_s25 = spop.drf %729  ;;  %p844_p2 = pneg %p843_p1 }
  0x5c   : > { %s91_s26 = ssub.s32 0, %s730_s25  ;;  %s732_s28 = spop.drf %731 }
  0x5d   : > { %s1110_s26 = smov (!%p86_p4, %s91_s26), %s730_s25  ;;  %s109_s29 = ssub.s32 0, %s732_s28 }
  0x5e   : > { %p544_p11 = scmp.lt.s32.totalorder %s1110_s26, 0  ;;  %s97_s27 = sadd.s32 3, %s1110_s26 }
  0x5f   : > { %s1114_s29 = smov (!%p104_p10, %s109_s29), %s732_s28  ;;  %p850_p8 = por %p849_p7, %p848_p6 }
  0x60   : > { %s1112_s27 = smov (!%p544_p11, %s97_s27), %s1110_s26  ;;  %p548_p12 = scmp.lt.s32.totalorder %s1114_s29, 0 }
  0x61   : > { %s562_s7 = sshll.u32 %s1112_s27, 5  ;;  %s115_s8 = sadd.s32 3, %s1114_s29 }
  0x62   : > { %s1116_s8 = smov (!%p548_p12, %s115_s8), %s1114_s29  ;;  %p851_p9 = pnand %p850_p8, %p844_p2 }
  0x63   : > { %s561_s13 = sshll.u32 %s1116_s8, 5  ;;  %s124_s2 = scalar_lea.sflag [#allocation3], %s1116_s8 }
  0x64   : > { %s123_s15 = scalar_lea.vmem [#allocation2], %s561_s13 }
  0x65   : > { %s132_s16 = sshll.u32 %s123_s15, 4  ;;  %s133_s16 = int_to_ptr.vmem [resolvable:$true] %s132_s16 }
  0x66   : > { %854 = shalt.err (!%p851_p9)  }
  0x67   : > { %s855_s21 = scalar_lea.vmem %s133_s16, 512  ;;  %p862_p12 = scmp.lt.s32.totalorder %s133_s16, %s983_s24 }
  0x68   : > { %p856_p4 = scmp.ne.s32.totalorder %s133_s16, %s855_s21  ;;  %p863_p0 = scmp.lt.s32.totalorder %s1008_s11, %s855_s21 }
  0x6a   : > { %p857_p10 = pnand %p856_p4, %p705_p13  ;;  %p864_p1 = por %p863_p0, %p862_p12 }
  0x6c   : > { %p858_p11 = pneg %p857_p10 }
  0x6e   : > { %p865_p3 = pnand %p864_p1, %p858_p11 }
  0x70   : > { %868 = shalt.err (!%p865_p3)  }
  0x71   : > { %704 = dma.hbm_to_vmem [thread:$0]  (%p705_p13), %s530_s14, 512, %s133_s16, %s124_s2 }
  0x72   : > { %s1071_s22 = scalar_lea.vmem [#allocation2], %s562_s7  ;;  %s139_s3 = scalar_lea.sflag [#allocation3], %s1112_s27 }
  0x73   : > { %900 = dma.done.wait %s139_s3, 512 }
  0x74   : > { %901 = vsyncadd %s139_s3, 4294966784  ;;  %v917_v1 = vmov 0.0   ;;  %v918_v2 = vmov 0   ;;  %v151_v3 = vld [vmem:[#allocation6 + $0x8] sm:$0xff]  ;;  %v150_v5 = vld [vmem:[#allocation6] sm:$0xff] }
  0x75   : > { %278 = vmatprep.mubr.f32.mxu0 %v917_v1  ;;  %349 = vmatprep.mubr.f32.mxu1 %v917_v1  ;;  %v155_v4 = vld [vmem:[#allocation6 + $0x28] sm:$0xff]  ;;  %v154_v7 = vld [vmem:[#allocation6 + $0x20] sm:$0xff]  ;;  %v153_v21 = vld [vmem:[#allocation6 + $0x18] sm:$0xff] }
  0x76   : > { %733 = vset.pattern.permute.xlu0 %v918_v2  ;;  %v615_v6 = vpack.c.bf16 %v155_v4, %v151_v3  ;;  %v159_v8 = vld [vmem:[#allocation6 + $0x48] sm:$0xff]  ;;  %v617_v10 = vpack.c.bf16 %v154_v7, %v150_v5  ;;  %v158_v12 = vld [vmem:[#allocation6 + $0x40] sm:$0xff]  ;;  %v157_v22 = vld [vmem:[#allocation6 + $0x38] sm:$0xff] }
  0x77   : > { %v163_v9 = vld [vmem:[#allocation6 + $0x68] sm:$0xff]  ;;  %v162_v13 = vld [vmem:[#allocation6 + $0x60] sm:$0xff]  ;;  %v647_v24 = vpack.c.bf16 %v157_v22, %v153_v21  ;;  %v152_v25 = vld [vmem:[#allocation6 + $0x10] sm:$0xff] }
  0x78   : > { %v619_v11 = vpack.c.bf16 %v163_v9, %v159_v8  ;;  %v167_v14 = vld [vmem:[#allocation6 + $0x88] sm:$0xff]  ;;  %616 = vmatprep.subr.bf16.mxu0 %v615_v6  ;;  %v621_v16 = vpack.c.bf16 %v162_v13, %v158_v12  ;;  %v166_v17 = vld [vmem:[#allocation6 + $0x80] sm:$0xff]  ;;  %v156_v26 = vld [vmem:[#allocation6 + $0x30] sm:$0xff]  ;;  %v385_v9 = vstv %s906_s19  ;;  %s85_s19 = sadd.s32 1, %s906_s19  }
  0x79   : > { %v171_v15 = vld [vmem:[#allocation6 + $0xa8] sm:$0xff]  ;;  %618 = vmatpush1.bf16.msra.mxu0 %v617_v10  ;;  %v170_v18 = vld [vmem:[#allocation6 + $0xa0] sm:$0xff]  ;;  %v649_v27 = vpack.c.bf16 %v156_v26, %v152_v25  ;;  %648 = vmatprep.subr.bf16.mxu1 %v647_v24  ;;  %v161_v29 = vld [vmem:[#allocation6 + $0x58] sm:$0xff]  ;;  %p82_p13 = scmp.ge.s32.totalorder %s85_s19, 8  }
  0x7a   : > { %620 = vmatprep.subr.bf16.mxu0 %v619_v11  ;;  %v623_v19 = vpack.c.bf16 %v171_v15, %v167_v14  ;;  %v175_v20 = vld [vmem:[#allocation6 + $0xc8] sm:$0xff]  ;;  %v625_v28 = vpack.c.bf16 %v170_v18, %v166_v17  ;;  %v165_v30 = vld [vmem:[#allocation6 + $0x78] sm:$0xff]  ;;  %v160_v31 = vld [vmem:[#allocation6 + $0x50] sm:$0xff]  ;;  %vm920_vm2 = vmmov (%p82_p13), 0   ;;  %s921_s24 = smov (%p82_p13), [#allocation11]  }
  0x7b   : > { %v179_v23 = vld [vmem:[#allocation6 + $0xe8] sm:$0xff]  ;;  %v174_v33 = vld [vmem:[#allocation6 + $0xc0] sm:$0xff]  ;;  %650 = vmatpush1.bf16.msra.mxu1 %v649_v27  ;;  %v651_v35 = vpack.c.bf16 %v165_v30, %v161_v29  ;;  %v164_v36 = vld [vmem:[#allocation6 + $0x70] sm:$0xff]  ;;  %s497_s30 = sshll.u32 (%p82_p13), %s921_s24, 4  ;;  %s498_s30 = int_to_ptr.vmem [resolvable:$true] %s497_s30 }
  0x7c   : > { %v627_v32 = vpack.c.bf16 %v179_v23, %v175_v20  ;;  %v178_v34 = vld [vmem:[#allocation6 + $0xe0] sm:$0xff]  ;;  %v183_v37 = vld [vmem:[#allocation6 + $0x108] sm:$0xff]  ;;  %v653_v39 = vpack.c.bf16 %v164_v36, %v160_v31  ;;  %v169_v40 = vld [vmem:[#allocation6 + $0x98] sm:$0xff]  ;;  %s870_s11 = scalar_lea.vmem (%p82_p13), %s498_s30, 128  ;;  %p875_p5 = scmp.lt.s32.totalorder (%p82_p13), %s498_s30, %s498_s30 }
  0x7d   : > { %622 = vmatpush1.bf16.msra.mxu0 %v621_v16  ;;  %v187_v38 = vld [vmem:[#allocation6 + $0x128] sm:$0xff]  ;;  %652 = vmatprep.subr.bf16.mxu1 %v651_v35  ;;  %v173_v41 = vld [vmem:[#allocation6 + $0xb8] sm:$0xff]  ;;  %v168_v42 = vld [vmem:[#allocation6 + $0x90] sm:$0xff]  ;;  %v629_v44 = vpack.c.bf16 %v178_v34, %v174_v33  ;;  %p871_p2 = scmp.ne.s32.totalorder (%p82_p13), %s498_s30, %s870_s11  ;;  %p876_p6 = scmp.lt.s32.totalorder (%p82_p13), %s870_s11, %s870_s11 }
  0x7e   : > { %624 = vmatprep.subr.bf16.mxu0 %v623_v19  ;;  %v172_v43 = vld [vmem:[#allocation6 + $0xb0] sm:$0xff]  ;;  %v182_v45 = vld [vmem:[#allocation6 + $0x100] sm:$0xff]  ;;  %v655_v47 = vpack.c.bf16 %v173_v41, %v169_v40  ;;  %v631_v48 = vpack.c.bf16 %v187_v38, %v183_v37  ;;  %v191_v49 = vld [vmem:[#allocation6 + $0x148] sm:$0xff] }
  0x7f   : > { %v186_v46 = vld [vmem:[#allocation6 + $0x120] sm:$0xff]  ;;  %654 = vmatpush1.bf16.msra.mxu1 %v653_v39  ;;  %v657_v50 = vpack.c.bf16 %v172_v43, %v168_v42  ;;  %v177_v51 = vld [vmem:[#allocation6 + $0xd8] sm:$0xff]  ;;  %v195_v53 = vld [vmem:[#allocation6 + $0x168] sm:$0xff]  ;;  %p877_p7 = por (%p82_p13), %p876_p6, %p875_p5 }
  0x80   : > { %v181_v52 = vld [vmem:[#allocation6 + $0xf8] sm:$0xff]  ;;  %656 = vmatprep.subr.bf16.mxu1 %v655_v47  ;;  %v176_v55 = vld [vmem:[#allocation6 + $0xd0] sm:$0xff]  ;;  %v633_v57 = vpack.c.bf16 %v186_v46, %v182_v45  ;;  %v635_v60 = vpack.c.bf16 %v195_v53, %v191_v49  ;;  %v190_v61 = vld [vmem:[#allocation6 + $0x140] sm:$0xff] }
  0x81   : > { %626 = vmatpush1.bf16.msra.mxu0 %v625_v28  ;;  %v659_v54 = vpack.c.bf16 %v181_v52, %v177_v51  ;;  %v180_v56 = vld [vmem:[#allocation6 + $0xf0] sm:$0xff]  ;;  %v185_v58 = vld [vmem:[#allocation6 + $0x118] sm:$0xff]  ;;  %v194_v62 = vld [vmem:[#allocation6 + $0x160] sm:$0xff]  ;;  %p878_p8 = pnand (%p82_p13), %p877_p7, %p871_p2 }
  0x82   : > { %628 = vmatprep.subr.bf16.mxu0 %v627_v32  ;;  %v189_v59 = vld [vmem:[#allocation6 + $0x138] sm:$0xff]  ;;  %v199_v63 = vld [vmem:[#allocation6 + $0x188] sm:$0xff]  ;;  %v661_v1 = vpack.c.bf16 %v180_v56, %v176_v55  ;;  %v184_v5 = vld [vmem:[#allocation6 + $0x110] sm:$0xff]  ;;  %v637_v10 = vpack.c.bf16 %v194_v62, %v190_v61 }
  0x83   : > { %658 = vmatpush1.bf16.msra.mxu1 %v657_v50  ;;  %v203_v3 = vld [vmem:[#allocation6 + $0x1a8] sm:$0xff]  ;;  %v663_v4 = vpack.c.bf16 %v189_v59, %v185_v58  ;;  %v188_v6 = vld [vmem:[#allocation6 + $0x130] sm:$0xff]  ;;  %v193_v7 = vld [vmem:[#allocation6 + $0x158] sm:$0xff] }
  0x84   : > { %660 = vmatprep.subr.bf16.mxu1 %v659_v54  ;;  %v197_v8 = vld [vmem:[#allocation6 + $0x178] sm:$0xff]  ;;  %v198_v11 = vld [vmem:[#allocation6 + $0x180] sm:$0xff]  ;;  %v639_v12 = vpack.c.bf16 %v203_v3, %v199_v63  ;;  %v207_v14 = vld [vmem:[#allocation6 + $0x1c8] sm:$0xff]  ;;  %v665_v15 = vpack.c.bf16 %v188_v6, %v184_v5 }
  0x85   : > { %630 = vmatpush1.bf16.msra.mxu0 %v629_v44  ;;  %v202_v13 = vld [vmem:[#allocation6 + $0x1a0] sm:$0xff]  ;;  %v384_v16 = vld [vmem:[%s1104_s1] sm:$0xff]  ;;  %v211_v17 = vld [vmem:[#allocation6 + $0x1e8] sm:$0xff]  ;;  %v667_v18 = vpack.c.bf16 %v197_v8, %v193_v7 }
  0x86   : > { %632 = vmatprep.subr.bf16.mxu0 %v631_v48  ;;  %v192_v19 = vld [vmem:[#allocation6 + $0x150] sm:$0xff]  ;;  %vm386_vm0 = vcmp.gt.s32.totalorder %v384_v16, %v385_v9  ;;  %v201_v21 = vld [vmem:[#allocation6 + $0x198] sm:$0xff]  ;;  %v641_v24 = vpack.c.bf16 %v202_v13, %v198_v11  ;;  %v643_v25 = vpack.c.bf16 %v211_v17, %v207_v14  ;;  %v206_v26 = vld [vmem:[#allocation6 + $0x1c0] sm:$0xff] }
  0x87   : > { %662 = vmatpush1.bf16.msra.mxu1 %v661_v1  ;;  %v196_v20 = vld [vmem:[#allocation6 + $0x170] sm:$0xff]  ;;  %v205_v22 = vld [vmem:[#allocation6 + $0x1b8] sm:$0xff]  ;;  %v387_v23 = vsel %vm386_vm0, 1, %v918_v2  ;;  %v210_v27 = vld [vmem:[#allocation6 + $0x1e0] sm:$0xff] }
  0x88   : > { %664 = vmatprep.subr.bf16.mxu1 %v663_v4  ;;  %389 = vperm.xlu0 %733, %v387_v23   ;;  %v669_v28 = vpack.c.bf16 %v196_v20, %v192_v19  ;;  %v671_v29 = vpack.c.bf16 %v205_v22, %v201_v21  ;;  %v200_v30 = vld [vmem:[#allocation6 + $0x190] sm:$0xff]  ;;  %v209_v32 = vld [vmem:[#allocation6 + $0x1d8] sm:$0xff]  ;;  %v645_v34 = vpack.c.bf16 %v210_v27, %v206_v26  ;;  %v149_v48 = vld [vmem:[%s1071_s22 + $0x18] sm:$0xff] }
  0x89   : > { %634 = vmatpush1.bf16.msra.mxu0 %v633_v57  ;;  %v204_v31 = vld [vmem:[#allocation6 + $0x1b0] sm:$0xff]  ;;  %v213_v33 = vld [vmem:[#allocation6 + $0x1f8] sm:$0xff]  ;;  %v148_v52 = vld [vmem:[%s1071_s22 + $0x10] sm:$0xff] }
  0x8a   : > { %636 = vmatprep.subr.bf16.mxu0 %v635_v60  ;;  %v673_v2 = vpack.c.bf16 %v204_v31, %v200_v30  ;;  %v675_v35 = vpack.c.bf16 %v213_v33, %v209_v32  ;;  %v208_v36 = vld [vmem:[#allocation6 + $0x1d0] sm:$0xff]  ;;  %v147_v41 = vld [vmem:[%s1071_s22 + $0x8] sm:$0xff]  ;;  %v398_v13 = vld [vmem:[#allocation9 + $0x8] sm:$0xff] (%p82_p13) }
  0x8b   : > { %666 = vmatpush1.bf16.msra.mxu1 %v665_v15  ;;  %v212_v37 = vld [vmem:[#allocation6 + $0x1f0] sm:$0xff]  ;;  %v145_v61 = vld [vmem:[#allocation5] sm:$0xff]  ;;  %v919_v15 = vmov (%p82_p13), 0.0|0.0   ;;  %v401_v19 = vld [vmem:[#allocation9 + $0x20] sm:$0xff] (%p82_p13) }
  0x8c   : > { %668 = vmatprep.subr.bf16.mxu1 %v667_v18  ;;  %v144_v38 = vld [vmem:[#allocation4] sm:$0xff]  ;;  %v677_v39 = vpack.c.bf16 %v212_v37, %v208_v36  ;;  %v400_v17 = vld [vmem:[#allocation9 + $0x18] sm:$0xff] (%p82_p13)  ;;  %v402_v20 = vld [vmem:[#allocation9 + $0x28] sm:$0xff] (%p82_p13) }
  0x8d   : > { %638 = vmatpush1.bf16.msra.mxu0 %v637_v10  ;;  %v146_v40 = vld [vmem:[%s1071_s22] sm:$0xff]  ;;  %v686_v21 = vpack.c.bf16 (%p82_p13), %v402_v20, %v401_v19  ;;  %v404_v23 = vld [vmem:[#allocation9 + $0x38] sm:$0xff] (%p82_p13)  ;;  %v406_v26 = vld [vmem:[#allocation9 + $0x48] sm:$0xff] (%p82_p13) }
  0x8e   : > { %640 = vmatprep.subr.bf16.mxu0 %v639_v12  ;;  %v397_v12 = vld [vmem:[#allocation9] sm:$0xff] (%p82_p13)  ;;  %v399_v14 = vld [vmem:[#allocation9 + $0x10] sm:$0xff] (%p82_p13)  ;;  %v410_v31 = vld [vmem:[#allocation9 + $0x68] sm:$0xff] (%p82_p13) }
  0x8f   : > { %670 = vmatpush1.bf16.msra.mxu1 %v669_v28  ;;  %v680_v16 = vpack.c.bf16 (%p82_p13), %v398_v13, %v397_v12  ;;  %v683_v18 = vpack.c.bf16 (%p82_p13), %v400_v17, %v399_v14  ;;  %v403_v22 = vld [vmem:[#allocation9 + $0x30] sm:$0xff] (%p82_p13)  ;;  %v409_v30 = vld [vmem:[#allocation9 + $0x60] sm:$0xff] (%p82_p13) }
  0x90   : > { %672 = vmatprep.subr.bf16.mxu1 %v671_v29  ;;  %v407_v28 = vld [vmem:[#allocation9 + $0x50] sm:$0xff] (%p82_p13)  ;;  %v698_v32 = vpack.c.bf16 (%p82_p13), %v410_v31, %v409_v30 }
  0x91   : > { %642 = vmatpush1.bf16.msra.mxu0 %v641_v24  ;;  %v689_v24 = vpack.c.bf16 (%p82_p13), %v404_v23, %v403_v22  ;;  %v411_v33 = vld [vmem:[#allocation9 + $0x70] sm:$0xff] (%p82_p13) }
  0x92   : > { %644 = vmatprep.subr.bf16.mxu0 %v643_v25  ;;  %v405_v25 = vld [vmem:[#allocation9 + $0x40] sm:$0xff] (%p82_p13)  ;;  %v557_v36 = vld [vmem:[%s1107_s4] ss:$0 sm:$0xff] (%p82_p13) }
  0x93   : > { %674 = vmatpush1.bf16.msra.mxu1 %v673_v2  ;;  %v692_v27 = vpack.c.bf16 (%p82_p13), %v406_v26, %v405_v25 }
  0x94   : > { %676 = vmatprep.subr.bf16.mxu1 %v675_v35 }
  0x95   : > { %646 = vmatpush1.bf16.msra.mxu0 %v645_v34  ;;  %v412_v34 = vld [vmem:[#allocation9 + $0x78] sm:$0xff] (%p82_p13) }
  0x96   :  { %679 = vmatprep.subr.bf16.mxu0 (%p82_p13), %v919_v15  ;;  %v701_v2 = vpack.c.bf16 (%p82_p13), %v412_v34, %v411_v33 }
  0x97   : > { %678 = vmatpush1.bf16.msra.mxu1 %v677_v39 }
  0x98   : > { %279 = vmatmul.mubr.f32.vlgmr.msra.gmra.mrb[0].mxu0 %v144_v38 }
  0x99   :  { %612 = vmatprep.mubr.msk.f32.mxu0 (%p82_p13), %vm920_vm2, %v915_v0  ;;  %681 = vmatpush3.bf16.msra.mxu0 (%p82_p13), %v680_v16  ;;  %v408_v0 = vld [vmem:[#allocation9 + $0x58] sm:$0xff] (%p82_p13) }
  0x9a   : > { %350 = vmatmul.mubr.f32.vlgmr.msra.gmra.mrb[0].mxu1 %v144_v38  ;;  %682 = vmatprep.subr.bf16.mxu0 (%p82_p13), %v919_v15  ;;  %v695_v29 = vpack.c.bf16 (%p82_p13), %v408_v0, %v407_v28 }
  0x9d   :  { %684 = vmatpush3.bf16.msra.mxu0 (%p82_p13), %v683_v18 }
  0x9e   :  { %685 = vmatprep.subr.bf16.mxu0 (%p82_p13), %v919_v15 }
  0xa1   :  { %687 = vmatpush3.bf16.msra.mxu0 (%p82_p13), %v686_v21 }
  0xa2   :  { %688 = vmatprep.subr.bf16.mxu0 (%p82_p13), %v919_v15 }
  0xa5   :  { %690 = vmatpush3.bf16.msra.mxu0 (%p82_p13), %v689_v24 }
  0xa6   :  { %691 = vmatprep.subr.bf16.mxu0 (%p82_p13), %v919_v15 }
  0xa9   :  { %693 = vmatpush3.bf16.msra.mxu0 (%p82_p13), %v692_v27 }
  0xaa   :  { %694 = vmatprep.subr.bf16.mxu0 (%p82_p13), %v919_v15 }
  0xad   :  { %696 = vmatpush3.bf16.msra.mxu0 (%p82_p13), %v695_v29 }
  0xae   :  { %697 = vmatprep.subr.bf16.mxu0 (%p82_p13), %v919_v15 }
  0xb1   :  { %699 = vmatpush3.bf16.msra.mxu0 (%p82_p13), %v698_v32 }
  0xb2   :  { %700 = vmatprep.subr.bf16.mxu0 (%p82_p13), %v919_v15 }
  0xb5   :  { %702 = vmatpush3.bf16.msra.mxu0 (%p82_p13), %v701_v2 }
 0x107   : > { %v390_v1 = vpop.permute.xlu0 %389 }
 0x108   : > { %vm391_vm1 = vcmp.eq.s32.totalorder %v390_v1, 1 }
 0x16b   : > { %v280_v42 = vpop.f32.mrb[0].mxu0 }
 0x16c   : > { %v356_v43 = vadd.f32 %v280_v42, %v146_v40  ;;  %v282_v44 = vpop.f32.mrb[1].mxu0 }
 0x16d   : > { %v357_v45 = vadd.f32 %v282_v44, %v147_v41  ;;  %v351_v49 = vpop.f32.mrb[0].mxu1 }
 0x16e   : > { %v554_v46 = vmul.f32 -1.442695, %v356_v43  ;;  %v353_v50 = vpop.f32.mrb[1].mxu1  ;;  %v358_v54 = vadd.f32 %v351_v49, %v148_v52 }
 0x16f   : > { %v555_v47 = vmul.f32 -1.442695, %v357_v45  ;;  %v359_v51 = vadd.f32 %v353_v50, %v149_v48 }
 0x170   : > { %734 = vpow2.f32 %v554_v46 }
 0x171   : > { %736 = vpow2.f32 %v555_v47  ;;  %v556_v53 = vmul.f32 -1.442695, %v359_v51 }
 0x173   : > { %738 = vpow2.f32 %v556_v53 }
 0x174   : > { %740 = vtanh.f32 %v358_v54 }
 0x17a   : > { %v735_v55 = vpop.eup %734 }
 0x17b   : > { %v737_v56 = vpop.eup %736  ;;  %v363_v57 = vadd.f32 1.0, %v735_v55 }
 0x17c   : > { %v369_v58 = vadd.f32 1.0, %v737_v56 }
 0x17d   : > { %742 = vrcp.f32 %v363_v57  ;;  %v739_v59 = vpop.eup %738 }
 0x17e   : > { %744 = vrcp.f32 %v369_v58  ;;  %v741_v60 = vpop.eup %740  ;;  %v376_v63 = vadd.f32 1.0, %v739_v59 }
 0x180   : > { %746 = vrcp.f32 %v376_v63 }
 0x187   : > { %v743_v62 = vpop.eup %742 }
 0x188   : > { %v745_v3 = vpop.eup %744  ;;  %v380_v4 = vmul.f32 %v743_v62, %v741_v60 }
 0x189   : > { %v379_v5 = vmul.f32 %v745_v3, %v145_v61 }
 0x18a   : > { %v747_v8 = vpop.eup %746 }
 0x18b   : > { %v381_v6 = vadd.f32 %v380_v4, %v379_v5 }
 0x18d   : > { %748 = vtanh.f32 %v381_v6  ;;  %v394_v7 = vsel %vm391_vm1, %v381_v6, %v145_v61 }
 0x18e   : > { %395 = vst [vmem:[#allocation5] sm:$0xff] %v394_v7 }
 0x195   :  { %84 = sbr.rel (!%p82_p13) target bundleno = 80 (0x50), region = 78 }
 0x197   : > { %v749_v9 = vpop.eup %748 }
 0x198   : > { %v383_v10 = vmul.f32 %v749_v9, %v747_v8 }
 0x19a   : > { %v392_v11 = vsel %vm391_vm1, %v383_v10, %v144_v38 }
 0x19b   : > { %393 = vst [vmem:[#allocation4] sm:$0xff] %v392_v11 }
 0x1a2   :  { %v396_v35 = vld [vmem:[#allocation4] sm:$0xff] }
 0x1a3   :  { %613 = vmatmul.mubr.f32.vlgmr.msra.gmra.mrb[0].mxu0 %v396_v35 }
 0x276   :  { %v486_v37 = vpop.f32.mrb[0].mxu0 }
 0x277   :  { %v487_v38 = vadd.f32 %v557_v36, %v486_v37  ;;  %v614_v39 = vpop.f32.mrb[1].mxu0 }
 0x279   :  { %490 = vst [vmem:[#allocation11] sm:$0xff] %v487_v38 }
 0x27a   :  { %881 = shalt.err (!%p878_p8)
}
 0x27b   :  { %s882_s27 = scalar_lea.hbm %s1108_s5, 128 }
 0x27c   :  { %p883_p9 = scmp.ne.s32.totalorder %s1108_s5, %s882_s27  ;;  %p886_p4 = scmp.lt.u32.totalorder %s882_s27, %s1108_s5 }
 0x27e   :  { %p888_p10 = pnand %p886_p4, %p883_p9 }
 0x280   :  { %891 = shalt.err (!%p888_p10)
}
 0x281   :  { %500 = dma.vmem_to_hbm [thread:$0]  %s498_s30, 128, %s1108_s5, [#allocation8]  }
 0x282   :  { %902 = dma.done.wait [#allocation8], 128  }
 0x283   :  { %903 = vsyncadd [#allocation8], 4294967168 }
 0x284   :  { %504 = vsyncpa [#allocation7], 1 }
 0x285   :  { %505 = vsyncpa [#allocation10], 1 }
 0x286   :  { %506 = vsyncpa [#allocation8], 1 }
 0x287   :  { %507 = vsyncmov [#allocation3] }
 0x28a   :  { %s508_s9 = vpop.sfrf %507 }
 0x28b   :  { %p558_p11 = scmp.ne.s32.totalorder %s508_s9, 0 }
 0x28d   :  { %512 = shalt.err (%p558_p11)  }
 0x28e   :  { %514 = vsyncmov [#allocation3 + $0x1] }
 0x291   :  { %s515_s10 = vpop.sfrf %514 }
 0x292   :  { %p559_p12 = scmp.ne.s32.totalorder %s515_s10, 0 }
 0x294   :  { %519 = shalt.err (%p559_p12)  }
 0x295   :  { %521 = vsyncmov [#allocation3 + $0x2] }
 0x298   :  { %s522_s12 = vpop.sfrf %521 }
 0x299   :  { %p560_p0 = scmp.ne.s32.totalorder %s522_s12, 0 }
 0x29b   :  { %526 = shalt.err (%p560_p0)  }

</bundles_post_ra>
